<compile_context>
chip_gen: v7x
topology: tpu7x:2x2x1
jax: 0.10.0
libtpu: 0.0.40
codegen_flags: <defaults>
</compile_context>

<pallas_src>
import math

import jax
import jax.numpy as jnp
from jax.experimental import pallas as pl
from jax.experimental.pallas import tpu as pltpu

BN_EPS = 1e-5


def _spec(shape):
    nd = len(shape)
    return pl.BlockSpec(shape, lambda *_args, _nd=nd: (0,) * _nd)


def _choose_tm(m):
    """Largest lane tile (multiple of 128) that divides M; else the full extent."""
    for t in (512, 256, 128):
        if m % t == 0:
            return t
    return m


# ---------------------------------------------------------------------------
# Conv matmul pass 1:  y(Cout, M) = W(Cout, K) @ col(K, M)  (bf16 in, f32 acc)
# also emits per-M-tile per-channel sum / sum-of-squares for the two-phase BN.
# ---------------------------------------------------------------------------
def matmul_stats(w_bf16, col_bf16):
    Cout, K = w_bf16.shape
    K2, M = col_bf16.shape
    assert K == K2
    tm = _choose_tm(M)
    gm = M // tm

    def kernel(w_ref, c_ref, y_ref, s_ref, ss_ref):
        y = jnp.dot(w_ref[...], c_ref[...], preferred_element_type=jnp.float32)
        y_ref[...] = y
        s_ref[...] = jnp.sum(y, axis=1, keepdims=True)[None]        # (1, Cout, 1)
        ss_ref[...] = jnp.sum(y * y, axis=1, keepdims=True)[None]   # (1, Cout, 1)

    return pl.pallas_call(
        kernel,
        grid=(gm,),
        in_specs=[pl.BlockSpec((Cout, K), lambda i: (0, 0)),
                  pl.BlockSpec((K, tm), lambda i: (0, i))],
        out_specs=[pl.BlockSpec((Cout, tm), lambda i: (0, i)),
                   pl.BlockSpec((1, Cout, 1), lambda i: (i, 0, 0)),
                   pl.BlockSpec((1, Cout, 1), lambda i: (i, 0, 0))],
        out_shape=(jax.ShapeDtypeStruct((Cout, M), jnp.float32),
                   jax.ShapeDtypeStruct((gm, Cout, 1), jnp.float32),
                   jax.ShapeDtypeStruct((gm, Cout, 1), jnp.float32)),
        compiler_params=pltpu.CompilerParams(dimension_semantics=("parallel",)),
    )(w_bf16, col_bf16)


# ---------------------------------------------------------------------------
# Conv pass 2:  BatchNorm finalize (global batch stats from the per-tile partials)
# fused with optional residual add, ReLU and straight-through mask mixing:
#     out = w_comp(m) * relu(bn(y) + residual) + w_skip(m) * prev
# ---------------------------------------------------------------------------
def bn_finalize(y, s_part, ss_part, *, relu, residual=None, prev=None, coef=None):
    Cout, M = y.shape
    tm = _choose_tm(M)
    gm = M // tm
    inv_m = 1.0 / float(M)
    have_res = residual is not None
    have_mix = prev is not None

    def kernel(*refs):
        s_ref, ss_ref, y_ref = refs[0], refs[1], refs[2]
        idx = 3
        mean = jnp.sum(s_ref[...], axis=0) * inv_m          # (Cout, 1)
        ex2 = jnp.sum(ss_ref[...], axis=0) * inv_m
        var = ex2 - mean * mean                             # biased var (training BN)
        out = (y_ref[...] - mean) * jax.lax.rsqrt(var + BN_EPS)
        if have_res:
            out = out + refs[idx][...]
            idx += 1
        if relu:
            out = jnp.maximum(out, 0.0)
        if have_mix:
            prev_ref = refs[idx]
            coef_ref = refs[idx + 1]
            idx += 2
            out = coef_ref[1:2, :] * out + coef_ref[0:1, :] * prev_ref[...]
        refs[-1][...] = out

    inputs = [s_part, ss_part, y]
    in_specs = [pl.BlockSpec((gm, Cout, 1), lambda i: (0, 0, 0)),
                pl.BlockSpec((gm, Cout, 1), lambda i: (0, 0, 0)),
                pl.BlockSpec((Cout, tm), lambda i: (0, i))]
    if have_res:
        inputs.append(residual)
        in_specs.append(pl.BlockSpec((Cout, tm), lambda i: (0, i)))
    if have_mix:
        inputs.extend([prev, coef])
        in_specs.append(pl.BlockSpec((Cout, tm), lambda i: (0, i)))
        in_specs.append(pl.BlockSpec((2, tm), lambda i: (0, i)))

    return pl.pallas_call(
        kernel,
        grid=(gm,),
        in_specs=in_specs,
        out_specs=pl.BlockSpec((Cout, tm), lambda i: (0, i)),
        out_shape=jax.ShapeDtypeStruct((Cout, M), jnp.float32),
        compiler_params=pltpu.CompilerParams(dimension_semantics=("parallel",)),
    )(*inputs)


# ---------------------------------------------------------------------------
# Convolution glue: transposed im2col (K = Cin*k*k on sublanes, M = B*Ho*Wo on lanes)
# ---------------------------------------------------------------------------
def _im2col_t(x_cbhw, k, stride, pad):
    C, B, H, W = x_cbhw.shape
    xp = jnp.pad(x_cbhw.astype(jnp.bfloat16),
                 ((0, 0), (0, 0), (pad, pad), (pad, pad)))
    Ho = (H + 2 * pad - k) // stride + 1
    Wo = (W + 2 * pad - k) // stride + 1
    taps = []
    for dy in range(k):
        for dx in range(k):
            taps.append(xp[:, :, dy:dy + stride * (Ho - 1) + 1:stride,
                           dx:dx + stride * (Wo - 1) + 1:stride])
    col = jnp.stack(taps, axis=1).reshape(C * k * k, B * Ho * Wo)  # K order = (cin, dy, dx)
    # TODO(synk): the 9x-expanded im2col operand is still materialized in HBM (in bf16);
    #             fully fusing the 3x3 tap gather into the matmul kernel would cut that
    #             traffic another ~9x.
    return col, (Ho, Wo)


def conv_bn(x_cbhw, w_flat, *, k, stride, relu, residual=None, prev=None, coef=None):
    Cin, B, H, W = x_cbhw.shape
    Cout = w_flat.shape[0]
    if k == 1:
        xs = x_cbhw[:, :, ::stride, ::stride]
        Ho, Wo = xs.shape[2], xs.shape[3]
        col = xs.reshape(Cin, B * Ho * Wo).astype(jnp.bfloat16)
    else:
        col, (Ho, Wo) = _im2col_t(x_cbhw, k, stride, 1)
    M = B * Ho * Wo
    y, s_part, ss_part = matmul_stats(w_flat, col)
    res_flat = None if residual is None else residual.reshape(Cout, M)
    prev_flat = None if prev is None else prev.reshape(Cout, M)
    out = bn_finalize(y, s_part, ss_part, relu=relu,
                      residual=res_flat, prev=prev_flat, coef=coef)
    return out.reshape(Cout, B, Ho, Wo)


# ---------------------------------------------------------------------------
# Fused gate step: AvgPool(full) + 1x1 conv + ReLU + 1x1 conv + LSTM cell + Linear
# proj + Softmax + hard (==max) mask.  All tensors kept in (feature, batch) layout
# so every weight stays in its native PyTorch (out, in) layout.
# ---------------------------------------------------------------------------
def gate_step(x_cbhw, gp, cp, h, c):
    C, B, H, W = x_cbhw.shape
    x3 = x_cbhw.reshape(C, B, H * W)
    Hd = cp["w_hh"].shape[1]
    P = cp["proj_w"].shape[0]

    def kernel(x_ref, w1_ref, b1_ref, w2_ref, b2_ref, wih_ref, whh_ref, b_ref,
               pw_ref, pb_ref, h_ref, c_ref, h_out, c_out, prob_out, hard_out):
        pooled = jnp.mean(x_ref[...], axis=2)                                    # (C, B)
        g1 = jnp.maximum(
            jnp.dot(w1_ref[...], pooled, preferred_element_type=jnp.float32)
            + b1_ref[...], 0.0)                                                  # (Gd, B)
        feat = (jnp.dot(w2_ref[...], g1, preferred_element_type=jnp.float32)
                + b2_ref[...])                                                   # (E, B)
        gates = (jnp.dot(wih_ref[...], feat, preferred_element_type=jnp.float32)
                 + jnp.dot(whh_ref[...], h_ref[...], preferred_element_type=jnp.float32)
                 + b_ref[...])                                                   # (4H, B)
        i_g = jax.nn.sigmoid(gates[0 * Hd:1 * Hd, :])
        f_g = jax.nn.sigmoid(gates[1 * Hd:2 * Hd, :])
        g_g = jnp.tanh(gates[2 * Hd:3 * Hd, :])
        o_g = jax.nn.sigmoid(gates[3 * Hd:4 * Hd, :])
        c_new = f_g * c_ref[...] + i_g * g_g
        h_new = o_g * jnp.tanh(c_new)
        h_out[...] = h_new
        c_out[...] = c_new
        logits = (jnp.dot(pw_ref[...], h_new, preferred_element_type=jnp.float32)
                  + pb_ref[...])                                                 # (P, B)
        lmax = jnp.max(logits, axis=0, keepdims=True)
        e = jnp.exp(logits - lmax)
        prob = e / jnp.sum(e, axis=0, keepdims=True)        # nn.Softmax() over proj dim
        prob_out[...] = prob
        # reference uses (prob == prob.max(axis)) — equality (may be multi-hot on ties)
        hard_out[...] = (prob >= jnp.max(prob, axis=0, keepdims=True)).astype(jnp.float32)

    inputs = [x3, gp["w1"], gp["b1"], gp["w2"], gp["b2"],
              cp["w_ih"], cp["w_hh"], cp["b"], cp["proj_w"], cp["proj_b"], h, c]
    return pl.pallas_call(
        kernel,
        grid=(1,),
        in_specs=[_spec(a.shape) for a in inputs],
        out_specs=[_spec((Hd, B)), _spec((Hd, B)), _spec((P, B)), _spec((P, B))],
        out_shape=(jax.ShapeDtypeStruct((Hd, B), jnp.float32),
                   jax.ShapeDtypeStruct((Hd, B), jnp.float32),
                   jax.ShapeDtypeStruct((P, B), jnp.float32),
                   jax.ShapeDtypeStruct((P, B), jnp.float32)),
    )(*inputs)


def _straight_through(hard, prob):
    # value == hard; gradient flows only through prob (hard.detach() - prob.detach() + prob)
    # TODO(synk): end-to-end training through the pallas_calls needs a custom_vjp.
    return jax.lax.stop_gradient(hard - prob) + prob


# ---------------------------------------------------------------------------
# Fused final head: AvgPool2d(full) + fc
# ---------------------------------------------------------------------------
def avgpool_fc(x_cbhw, fc_w, fc_b):
    C, B, H, W = x_cbhw.shape
    x3 = x_cbhw.reshape(C, B, H * W)
    NC = fc_w.shape[0]

    def kernel(x_ref, w_ref, b_ref, o_ref):
        pooled = jnp.mean(x_ref[...], axis=2)                                    # (C, B)
        o_ref[...] = (jnp.dot(w_ref[...], pooled, preferred_element_type=jnp.float32)
                      + b_ref[...])

    out = pl.pallas_call(
        kernel,
        grid=(1,),
        in_specs=[_spec(x3.shape), _spec(fc_w.shape), _spec(fc_b.shape)],
        out_specs=_spec((NC, B)),
        out_shape=jax.ShapeDtypeStruct((NC, B), jnp.float32),
    )(x3, fc_w, fc_b)
    return out.T                                                                  # (B, NC)


# ---------------------------------------------------------------------------
# Parameters (deterministic synthetic init, shapes / init rules per the module)
# ---------------------------------------------------------------------------
def init_params(key, layers=(1, 1, 1), num_classes=10, gate_dim=32,
                embed_dim=16, hidden_dim=16, proj_dim=2):
    keys = iter(jax.random.split(key, 128))

    def nk():
        return next(keys)

    def conv_w(cout, cin, k):          # PyTorch (cout,cin,k,k), std = sqrt(2/(k*k*cout))
        std = math.sqrt(2.0 / (k * k * cout))
        w = jax.random.normal(nk(), (cout, cin, k, k), jnp.float32) * std
        return w.reshape(cout, cin * k * k).astype(jnp.bfloat16)    # bf16 MXU operand

    def bias(n, scale):
        return jax.random.uniform(nk(), (n, 1), jnp.float32, -scale, scale)

    def gate_params(cin):
        return {
            "w1": jax.random.normal(nk(), (gate_dim, cin), jnp.float32)
            * math.sqrt(2.0 / gate_dim),
            "b1": bias(gate_dim, 1.0 / math.sqrt(cin)),
            "w2": jax.random.normal(nk(), (embed_dim, gate_dim), jnp.float32)
            * math.sqrt(2.0 / embed_dim),
            "b2": bias(embed_dim, 1.0 / math.sqrt(gate_dim)),
        }

    s = 1.0 / math.sqrt(hidden_dim)
    params = {
        "conv1_w": conv_w(16, 3, 3),
        "gate1": gate_params(16),
        "control": {   # nn.LSTM(embed_dim, hidden_dim) + nn.Linear(hidden_dim, proj_dim)
            "w_ih": jax.random.uniform(nk(), (4 * hidden_dim, embed_dim), jnp.float32, -s, s),
            "w_hh": jax.random.uniform(nk(), (4 * hidden_dim, hidden_dim), jnp.float32, -s, s),
            "b": jax.random.uniform(nk(), (4 * hidden_dim, 1), jnp.float32, -2 * s, 2 * s),
            "proj_w": jax.random.normal(nk(), (proj_dim, hidden_dim), jnp.float32)
            * math.sqrt(2.0 / (proj_dim * hidden_dim)),
            "proj_b": bias(proj_dim, s),
        },
        "fc_w": jax.random.normal(nk(), (num_classes, 64), jnp.float32)
        * math.sqrt(2.0 / (num_classes * 64)),
        "fc_b": bias(num_classes, 1.0 / math.sqrt(64)),
    }

    blocks = []
    inplanes = 16
    for g, planes in enumerate((16, 32, 64)):
        for i in range(layers[g]):
            stride = 2 if (g > 0 and i == 0) else 1
            has_ds = (stride != 1 or inplanes != planes)
            blocks.append({
                "stride": stride,
                "conv1_w": conv_w(planes, inplanes, 3),
                "conv2_w": conv_w(planes, planes, 3),
                "ds_w": conv_w(planes, inplanes, 1) if has_ds else None,
                "gate": gate_params(planes),
            })
            inplanes = planes
    params["blocks"] = blocks
    return params


# ---------------------------------------------------------------------------
# Forward pass (mirrors ResNetRecurrentGateSP.forward with BasicBlock)
# ---------------------------------------------------------------------------
def forward(params, x_nchw, bits, grad_bits):
    del grad_bits                       # only affects backward-pass quantization
    x = jnp.transpose(x_nchw, (1, 0, 2, 3)).astype(jnp.float32)     # NCHW -> CBHW
    B = x.shape[1]
    ctrl = params["control"]
    hid = ctrl["w_hh"].shape[1]

    # conv1 + bn1 + relu
    x = conv_bn(x, params["conv1_w"], k=3, stride=1, relu=True)

    # control.init_hidden(batch_size)
    h = jnp.zeros((hid, B), jnp.float32)
    c = jnp.zeros((hid, B), jnp.float32)

    h, c, prob, hard = gate_step(x, params["gate1"], ctrl, h, c)
    mask_bp = _straight_through(hard, prob).T                        # (B, proj_dim)

    zero_idx = [k for k, b in enumerate(bits) if b == 0]
    nz_idx = [k for k, b in enumerate(bits) if b != 0]

    masks = []
    prev = x
    for blk in params["blocks"]:
        stride = blk["stride"]
        if blk["ds_w"] is not None:
            # external: prev = group_ds(prev); prev = group_bn(prev)
            prev = conv_bn(x, blk["ds_w"], k=1, stride=stride, relu=False)
            residual = prev
        else:
            residual = x

        Cout, _, Ho, Wo = residual.shape
        w_skip = (mask_bp[:, zero_idx].sum(axis=1) if zero_idx
                  else jnp.zeros((B,), jnp.float32))
        w_comp = (mask_bp[:, nz_idx].sum(axis=1) if nz_idx
                  else jnp.zeros((B,), jnp.float32))
        coef = jnp.stack([w_skip, w_comp], axis=0)                   # (2, B)
        coef = jnp.broadcast_to(coef[:, :, None], (2, B, Ho * Wo)).reshape(2, B * Ho * Wo)

        if nz_idx:
            # BasicBlock: conv1->bn1->relu->conv2->bn2 (+residual) -> relu,
            # then straight-through mix with the skip candidate, fused in the epilogue.
            o1 = conv_bn(x, blk["conv1_w"], k=3, stride=stride, relu=True)
            x = conv_bn(o1, blk["conv2_w"], k=3, stride=1, relu=True,
                        residual=residual, prev=prev, coef=coef)
        else:
            # all candidates skip (not exercised in the demo)
            x = (prev.reshape(Cout, B * Ho * Wo) * coef[0:1]).reshape(Cout, B, Ho, Wo)

        prev = x
        masks.append([mask_bp[:, j] for j in range(len(bits))])

        h, c, prob, hard = gate_step(x, blk["gate"], ctrl, h, c)
        mask_bp = _straight_through(hard, prob).T

    logits = avgpool_fc(x, params["fc_w"], params["fc_b"])           # AvgPool2d(8) + fc
    return logits, masks


if __name__ == "__main__":
    key = jax.random.PRNGKey(0)
    pkey, xkey = jax.random.split(key)

    bits = (0, 4)            # candidate precisions: skip (0) and compute (4-bit path)
    grad_bits = (0, 4)
    params = init_params(pkey, layers=(1, 1, 1), proj_dim=len(bits))

    # CIFAR-style input (the gate AvgPool2d(32) implies 32x32 spatial), batch=2, NCHW.
    x = jax.random.normal(xkey, (2, 3, 32, 32), dtype=jnp.float32)

    logits, masks = forward(params, x, bits, grad_bits)
    jax.block_until_ready((logits, masks))
    assert logits.shape == (2, 10)
    assert len(masks) == 3 and len(masks[0]) == len(bits)
    print("KERNEL_OK")
</pallas_src>

<mosaic_0001>
module attributes {stable_mosaic.version = 11 : i64} {
  func.func @kernel(%arg0: i32, %arg1: memref<16x27xbf16, #tpu.memory_space<vmem>>, %arg2: memref<27x512xbf16, #tpu.memory_space<vmem>>, %arg3: memref<16x512xf32, #tpu.memory_space<vmem>>, %arg4: memref<1x16x1xf32, #tpu.memory_space<vmem>>, %arg5: memref<1x16x1xf32, #tpu.memory_space<vmem>>) attributes {dimension_semantics = [#tpu.dimension_semantics<parallel>], iteration_bounds = array<i64: 4>, scalar_prefetch = 0 : i64, scratch_operands = 0 : i64, tpu.core_type = #tpu.core_type<tc>, window_params = [{pipeline_mode = #tpu.pipeline_mode<synchronous>, transform_indices = @transform_0, window_bounds = array<i64: 16, 27>}, {transform_indices = @transform_1, window_bounds = array<i64: 27, 512>}, {transform_indices = @transform_2, window_bounds = array<i64: 16, 512>}, {transform_indices = @transform_3, window_bounds = array<i64: 1, 16, 1>}, {transform_indices = @transform_4, window_bounds = array<i64: 1, 16, 1>}]} {
    %c0 = arith.constant 0 : index
    %c0_0 = arith.constant 0 : index
    %0 = vector.load %arg1[%c0, %c0_0] : memref<16x27xbf16, #tpu.memory_space<vmem>>, vector<16x27xbf16>
    %c0_1 = arith.constant 0 : index
    %c0_2 = arith.constant 0 : index
    %1 = vector.load %arg2[%c0_1, %c0_2] : memref<27x512xbf16, #tpu.memory_space<vmem>>, vector<27x512xbf16>
    %cst = arith.constant dense<0.000000e+00> : vector<16x512xf32>
    %2 = tpu.matmul %0, %1, %cst {dimension_numbers = #tpu.dot_dimension_numbers<[1], [0], [0], [1], [0, 0, 1, 1], [], []>} : vector<16x27xbf16>, vector<27x512xbf16>, vector<16x512xf32> -> vector<16x512xf32>
    %c0_3 = arith.constant 0 : index
    %c0_4 = arith.constant 0 : index
    %3 = vector.load %arg3[%c0_3, %c0_4] : memref<16x512xf32, #tpu.memory_space<vmem>>, vector<16x512xf32>
    tpu.vector_store %arg3[%c0_3, %c0_4], %2 {strides = array<i32>} : memref<16x512xf32, #tpu.memory_space<vmem>>, vector<16x512xf32>,
    %cst_5 = arith.constant dense<0.000000e+00> : vector<16xf32>
    %4 = vector.multi_reduction <add>, %2, %cst_5 [1] : vector<16x512xf32> to vector<16xf32>
    %5 = vector.shape_cast %4 : vector<16xf32> to vector<16x1xf32>
    %6 = vector.shape_cast %5 : vector<16x1xf32> to vector<1x16x1xf32>
    %c0_6 = arith.constant 0 : index
    %c0_7 = arith.constant 0 : index
    %c0_8 = arith.constant 0 : index
    %7 = vector.load %arg4[%c0_6, %c0_7, %c0_8] : memref<1x16x1xf32, #tpu.memory_space<vmem>>, vector<1x16x1xf32>
    tpu.vector_store %arg4[%c0_6, %c0_7, %c0_8], %6 {strides = array<i32>} : memref<1x16x1xf32, #tpu.memory_space<vmem>>, vector<1x16x1xf32>,
    %8 = arith.mulf %2, %2 : vector<16x512xf32>
    %cst_9 = arith.constant dense<0.000000e+00> : vector<16xf32>
    %9 = vector.multi_reduction <add>, %8, %cst_9 [1] : vector<16x512xf32> to vector<16xf32>
    %10 = vector.shape_cast %9 : vector<16xf32> to vector<16x1xf32>
    %11 = vector.shape_cast %10 : vector<16x1xf32> to vector<1x16x1xf32>
    %c0_10 = arith.constant 0 : index
    %c0_11 = arith.constant 0 : index
    %c0_12 = arith.constant 0 : index
    %12 = vector.load %arg5[%c0_10, %c0_11, %c0_12] : memref<1x16x1xf32, #tpu.memory_space<vmem>>, vector<1x16x1xf32>
    tpu.vector_store %arg5[%c0_10, %c0_11, %c0_12], %11 {strides = array<i32>} : memref<1x16x1xf32, #tpu.memory_space<vmem>>, vector<1x16x1xf32>,
    return
  }
  func.func @transform_0(%arg0: i32) -> (i32, i32) {
    %c0_i32 = arith.constant 0 : i32
    %c0_i32_0 = arith.constant 0 : i32
    %c0_i32_1 = arith.constant 0 : i32
    return %c0_i32, %c0_i32_0 : i32, i32
  }
  func.func @transform_1(%arg0: i32) -> (i32, i32) {
    %c0_i32 = arith.constant 0 : i32
    %c0_i32_0 = arith.constant 0 : i32
    return %c0_i32, %arg0 : i32, i32
  }
  func.func @transform_2(%arg0: i32) -> (i32, i32) {
    %c0_i32 = arith.constant 0 : i32
    %c0_i32_0 = arith.constant 0 : i32
    return %c0_i32, %arg0 : i32, i32
  }
  func.func @transform_3(%arg0: i32) -> (i32, i32, i32) {
    %c0_i32 = arith.constant 0 : i32
    %c0_i32_0 = arith.constant 0 : i32
    %c0_i32_1 = arith.constant 0 : i32
    return %arg0, %c0_i32, %c0_i32_0 : i32, i32, i32
  }
  func.func @transform_4(%arg0: i32) -> (i32, i32, i32) {
    %c0_i32 = arith.constant 0 : i32
    %c0_i32_0 = arith.constant 0 : i32
    %c0_i32_1 = arith.constant 0 : i32
    return %arg0, %c0_i32, %c0_i32_0 : i32, i32, i32
  }
}

</mosaic_0001>

<bundles_post_ra>
// kernel: tpu_custom_call.1
= control target key start
LH: loop header
LB: loop body
LE: loop exit
PB: predicated region body
PF: predicated region fallthrough
CT: control target
= control target key end

     0   :  { %10 = vsyncpa [#allocation3], 0  ;;  %s1126_s0 = inlined_call_operand.hbm [shape: bf16[16,27], index: 0, kind: input, shape index: {}]   ;;  %s1127_s1 = inlined_call_operand.hbm [shape: bf16[27,2048], index: 1, kind: input, shape index: {}]   ;;  %s1128_s2 = inlined_call_operand.hbm [shape: f32[16,2048], index: 2, kind: output, shape index: {0}]   ;;  %s1129_s3 = inlined_call_operand.vmem [shape: f32[4,16,1], index: 3, kind: output, shape index: {1}]   ;;  %s1130_s4 = inlined_call_operand.vmem [shape: f32[4,16,1], index: 4, kind: output, shape index: {2}]  }
   0x1   :  { %11 = vsyncpa [#allocation6], 0 }
   0x2   :  { %13 = vsyncpa [#allocation6 + $0x1], 0 }
   0x3   :  { %14 = vsyncpa [#allocation4], 0 }
   0x4   :  { %16 = vsyncpa [#allocation4 + $0x1], 0  ;;  %s905_s15 = smov 0   ;;  %s907_s16 = smov 0  }
   0x5   :  { %s909_s17 = smov 0   ;;  %s911_s18 = smov 0  }
   0x6 LB: > { %s926_s19 = sadd.s32 4294967295, %s865_s18   ;;  %s622_s20 = sadd.s32 4294967294, %s865_s18   ;;  %s865_s18 = sphi %s911_s18, %s1153_s18   ;;  %s861_s17 = sphi %s909_s17, %s1152_s17   ;;  %s857_s16 = sphi %s907_s16, %s1151_s16   ;;  %s853_s15 = sphi %s905_s15, %s1150_s15  }
   0x7   : > { %s930_s21 = sadd.s32 1, %s865_s18   ;;  %s50_s22 = sadd.s32 1, %s861_s17 }
   0x8   : > { %s47_s23 = ssub.s32 %s865_s18, %s930_s21  ;;  %p57_p0 = scmp.ne.s32.totalorder %s861_s17, %s857_s16 }
   0x9   : > { %p48_p1 = scmp.eq.s32.totalorder %s47_s23, 0  ;;  %p58_p2 = scmp.eq.s32.totalorder %s865_s18, 0 }
   0xa   : > { %p63_p3 = scmp.ne.s32.totalorder %s857_s16, %s853_s15  ;;  %p1131_p4 = scmp.eq.s32.totalorder %s926_s19, 0 }
   0xb   : > { %s942_s24 = scalar_select %p48_p1, %s861_s17, %s50_s22  }
   0xc   : > { %p944_p5 = por %p58_p2, %p57_p0  ;;  %p950_p6 = por %p1131_p4, %p63_p3 }
   0xd   : > { %p87_p7 = scmp.eq.s32.totalorder %s926_s19, 3  ;;  %p93_p8 = scmp.eq.s32.totalorder %s622_s20, 3 }
   0xe   : > { %s1135_s25 = scalar_select %p944_p5, 1, 0 }
   0xf   : > { %s1136_s26 = scalar_select %p950_p6, 1, 0 }
  0x10   : > { %p623_p9 = scmp.ge.s32.totalorder %s865_s18, 1  ;;  %p152_p10 = scmp.lt.s32.totalorder %s865_s18, 5 }
  0x11   : > { %p957_p11 = por %p87_p7, %p57_p0  ;;  %p961_p12 = por %p93_p8, %p63_p3 }
  0x12   : > { %p965_p13 = pnand %p623_p9, %p152_p10  ;;  %s867_s30 = smov [#allocation2]  }
  0x13   : > { %s1137_s27 = scalar_select %p957_p11, 1, 0 }
  0x14   : > { %s1138_s28 = scalar_select %p961_p12, 1, 0 }
  0x15   : > { %s1139_s29 = scalar_select %p965_p13, 1, 0 }
  0x16   : > { %p665_p1 = pneg %p965_p13  ;;  %s164_s5 = sshll.u32 %s867_s30, 4  ;;  %s165_s5 = int_to_ptr.vmem [resolvable:$true] %s164_s5 }
  0x17   : > { %s178_s7 = sand.u32 1, %s861_s17   ;;  %s737_s10 = scalar_lea.hbm %s1126_s0, 128 }
  0x18   : > { %p973_p2 = pnand %p665_p1, %p1131_p4  ;;  %p738_p3 = scmp.ne.s32.totalorder %s1126_s0, %s737_s10 }
  0x19   : > { %p744_p10 = scmp.lt.u32.totalorder %s737_s10, %s1126_s0 }
  0x1a   : > { %p739_p7 = pneg %p973_p2 }
  0x1c   : > { %p740_p8 = pnand %p739_p7, %p738_p3 }
  0x1e   : > { %p741_p9 = pneg %p740_p8 }
  0x20   : > { %p746_p1 = pnand %p744_p10, %p741_p9 }
  0x22   : > { %749 = shalt.err (!%p746_p1)
}
  0x23   : > { %s750_s20 = scalar_lea.vmem %s165_s5, 128  ;;  %p758_p11 = scmp.lt.s32.totalorder %s165_s5, %s165_s5 }
  0x24   : > { %p751_p4 = scmp.ne.s32.totalorder %s165_s5, %s750_s20  ;;  %p759_p6 = scmp.lt.s32.totalorder %s750_s20, %s750_s20 }
  0x26   : > { %p753_p0 = pnand %p751_p4, %p739_p7  ;;  %p760_p13 = por %p759_p6, %p758_p11 }
  0x28   : > { %p754_p12 = pneg %p753_p0 }
  0x2a   : > { %p761_p5 = pnand %p760_p13, %p754_p12 }
  0x2c   : > { %764 = shalt.err (!%p761_p5)
}
  0x2d   : > { %s868_s22 = smov 64   ;;  %s869_s23 = smov 4  }
  0x2e   : > { %668 = dma.hbm_to_vmem [thread:$0]  (!%p973_p2), %s1126_s0, 128, %s165_s5, [#allocation3], %s868_s22, %s868_s22, %s869_s23  }
  0x2f   : > { %p1141_p3 = scmp.ne.s32.totalorder %s1135_s25, 0  ;;  %p1142_p8 = scmp.lt.s32.totalorder %s865_s18, 4 }
  0x30   : > { %s626_s10 = sshll.u32 %s178_s7, 6  ;;  %s653_s11 = sshll.u32 %s865_s18, 8 }
  0x31   : > { %p999_p4 = pnand %p1142_p8, %p1141_p3  ;;  %s1007_s14 = scalar_lea.hbm %s1127_s1, %s653_s11 }
  0x32   : > { %s182_s5 = scalar_lea.vmem [#allocation5], %s626_s10  ;;  %s1011_s6 = scalar_lea.sflag [#allocation6], %s178_s7 }
  0x33   : > { %s189_s25 = sshll.u32 %s182_s5, 4  ;;  %s765_s20 = scalar_lea.hbm %s1007_s14, 1024  ;;  %s1009_s25 = int_to_ptr.vmem [resolvable:$true] %s189_s25 }
  0x34   : > { %p766_p5 = scmp.ne.s32.totalorder %s1007_s14, %s765_s20  ;;  %p767_p6 = pneg %p999_p4 }
  0x35   : > { %s770_s30 = scalar_lea.hbm %s1127_s1, 4096  ;;  %p771_p13 = scmp.lt.u32.totalorder %s1007_s14, %s1127_s1 }
  0x36   : > { %p768_p11 = pnand %p767_p6, %p766_p5  ;;  %p772_p2 = scmp.lt.u32.totalorder %s770_s30, %s765_s20 }
  0x37   : > { %p774_p7 = scmp.lt.u32.totalorder %s765_s20, %s1007_s14 }
  0x38   : > { %p769_p12 = pneg %p768_p11  ;;  %p773_p0 = por %p772_p2, %p771_p13 }
  0x3a   : > { %p775_p9 = por %p774_p7, %p773_p0 }
  0x3c   : > { %p776_p10 = pnand %p775_p9, %p769_p12 }
  0x3e   : > { %779 = shalt.err (!%p776_p10)
}
  0x3f   : > { %s780_s7 = scalar_lea.vmem %s1009_s25, 1024  ;;  %s870_s10 = smov [#allocation5]  }
  0x40   : > { %p781_p1 = scmp.ne.s32.totalorder %s1009_s25, %s780_s7  ;;  %s785_s12 = sshll.u32 %s870_s10, 4  ;;  %s786_s12 = int_to_ptr.vmem [resolvable:$false] %s785_s12 }
  0x41   : > { %s787_s13 = scalar_lea.vmem %s786_s12, 2048  ;;  %p788_p5 = scmp.lt.s32.totalorder %s1009_s25, %s786_s12 }
  0x42   : > { %p783_p3 = pnand %p781_p1, %p767_p6  ;;  %p789_p11 = scmp.lt.s32.totalorder %s787_s13, %s780_s7 }
  0x44   : > { %p784_p8 = pneg %p783_p3  ;;  %p790_p13 = por %p789_p11, %p788_p5 }
  0x46   : > { %p791_p2 = pnand %p790_p13, %p784_p8 }
  0x48   : > { %794 = shalt.err (!%p791_p2)
}
  0x49   : > { %s871_s5 = smov 1024   ;;  %s872_s20 = smov 256  }
  0x4a   : > { %s873_s22 = smov 16   ;;  %p1144_p6 = scmp.ne.s32.totalorder %s1139_s29, 0 }
  0x4b   : > { %672 = dma.hbm_to_vmem [thread:$0]  (!%p999_p4), %s1007_s14, 1024, %s1009_s25, %s1011_s6, %s871_s5, %s872_s20, %s873_s22  }
  0x4c   : > { %201 = sbr.rel (%p1144_p6) target bundleno = 467 (0x1d3), region = 28  ;;  %p1145_p12 = scmp.eq.s32.totalorder (!%p1144_p6), %s926_s19, 0 }
  0x53   : > { %840 = dma.done.wait (%p1145_p12), [#allocation3], 128   ;;  %p1146_p0 = pmov %p1145_p12 }
  0x54   : > { %s1046_s23 = sand.u32 1, %s857_s16   ;;  %p1147_p4 = scmp.ne.s32.totalorder %s1136_s26, 0 }
  0x55   : > { %842 = vsyncadd (%p1146_p0), [#allocation3], 4294967168  ;;  %s631_s30 = sshll.u32 %s1046_s23, 6  ;;  %s208_s8 = scalar_lea.sflag [#allocation6], %s1046_s23 }
  0x56   : > { %s211_s9 = scalar_lea.vmem [#allocation5], %s631_s30 }
  0x57   : > { %844 = dma.done.wait (%p1147_p4), %s208_s8, 1024  }
  0x58   : > { %846 = vsyncadd (%p1147_p4), %s208_s8, 4294966272  ;;  %v874_v0 = vmov 0   ;;  %vm314_vm0 = vcmask 1044480   ;;  %vm315_vm1 = vcmask 1045504   ;;  %v875_v1 = vmov 65535   ;;  %v736_v16 = vld [vmem:[#allocation2] sm:$0xff]  }
  0x59   : > { %362 = vmatprep.mubr.bf16.mxu0 %v874_v0  ;;  %405 = vmatprep.mubr.bf16.mxu1 %v874_v0  ;;  %v316_v2 = vsel %vm314_vm0, 4294967295, %v875_v1  ;;  %v724_v3 = vld [vmem:[%s211_s9 + $0x4] ss:$16 sps:$4 sm:$0xff]   ;;  %v726_v4 = vld [vmem:[%s211_s9 + $0xc] ss:$16 sps:$4 sm:$0xff]   ;;  %vm310_vm2 = vcmask 220160  }
  0x5a   : > { %330 = vmatprep.subr.bf16.mxu0 %v724_v3  ;;  %v728_v5 = vld [vmem:[%s211_s9] ss:$16 sps:$4 sm:$0xff]   ;;  %v729_v6 = vld [vmem:[%s211_s9 + $0x8] ss:$16 sps:$4 sm:$0xff]   ;;  %v317_v7 = vsel %vm315_vm1, %v316_v2, 0  ;;  %373 = vmatprep.subr.bf16.mxu1 %v726_v4  ;;  %s1058_s26 = scalar_lea.vmem [#allocation7], %s631_s30 }
  0x5b   : > { %v730_v8 = vld [vmem:[%s211_s9 + $0x24] ss:$16 sps:$4 sm:$0x3f]   ;;  %331 = vmatpush1.bf16.msra.mxu0 %v728_v5  ;;  %374 = vmatpush1.bf16.msra.mxu1 %v729_v6  ;;  %v732_v9 = vld [vmem:[%s211_s9 + $0x2c] ss:$16 sps:$4 sm:$0x3f]  }
  0x5c   : > { %v322_v10 = vand.u32 %v730_v8, %v317_v7  ;;  %v734_v11 = vld [vmem:[%s211_s9 + $0x20] ss:$16 sps:$4 sm:$0x3f]   ;;  %v735_v12 = vld [vmem:[%s211_s9 + $0x28] ss:$16 sps:$4 sm:$0x3f]   ;;  %v328_v13 = vand.u32 %v732_v9, %v317_v7 }
  0x5d   : > { %v319_v14 = vand.u32 %v734_v11, %v317_v7  ;;  %v325_v15 = vand.u32 %v735_v12, %v317_v7  ;;  %s481_s29 = sshll.u32 %s1058_s26, 4  ;;  %s656_s14 = sshll.u32 %s926_s19, 9  ;;  %s1069_s29 = int_to_ptr.vmem [resolvable:$true] %s481_s29 }
  0x5e   : > { %332 = vmatprep.subr.bf16.mxu0 %v322_v10  ;;  %375 = vmatprep.subr.bf16.mxu1 %v328_v13  ;;  %s1075_s11 = scalar_lea.hbm %s1128_s2, %s656_s14  ;;  %s458_s7 = scalar_lea.sflag [#allocation4], %s1046_s23 }
  0x5f   : > { %333 = vmatpush1.bf16.msra.mxu0 %v319_v14  ;;  %376 = vmatpush1.bf16.msra.mxu1 %v325_v15  ;;  %s795_s10 = scalar_lea.vmem %s1069_s29, 1024  ;;  %p1148_p9 = scmp.ne.s32.totalorder %s1137_s27, 0 }
  0x60   : > { %p796_p7 = scmp.ne.s32.totalorder %s1069_s29, %s795_s10  ;;  %s876_s12 = smov [#allocation7]  }
  0x61   : > { %s799_s13 = sshll.u32 %s876_s12, 4  ;;  %s800_s13 = int_to_ptr.vmem [resolvable:$false] %s799_s13 }
  0x62   : > { %646 = vmatmul.mubr.msk.bf16.vlgmr.msra.gmra.mrb[0].mxu0 %vm310_vm2, %v736_v16  ;;  %647 = vmatmul.mubr.msk.bf16.vlgmr.msra.gmra.mrb[0].mxu1 %vm310_vm2, %v736_v16  ;;  %p797_p10 = pnand %p796_p7, %p1148_p9  ;;  %s801_s5 = scalar_lea.vmem %s800_s13, 2048 }
  0x63   : > { %p802_p3 = scmp.lt.s32.totalorder %s1069_s29, %s800_s13  ;;  %p803_p8 = scmp.lt.s32.totalorder %s801_s5, %s795_s10 }
  0x64   : > { %p798_p1 = pneg %p797_p10 }
  0x65   : > { %p804_p5 = por %p803_p8, %p802_p3 }
  0x67   : > { %p805_p11 = pnand %p804_p5, %p798_p1 }
 0x135   : > { %v364_v17 = vpop.f32.mrb[0].mxu0  ;;  %v407_v18 = vpop.f32.mrb[0].mxu1 }
 0x136   : > { %416 = vst [vmem:[%s1058_s26] sm:$0xff] %v364_v17  ;;  %v437_v19 = vmul.f32 %v364_v17, %v364_v17  ;;  %418 = vst [vmem:[%s1058_s26 + $0x10] sm:$0xff] %v407_v18  ;;  %v366_v20 = vpop.f32.mrb[1].mxu0  ;;  %v409_v21 = vpop.f32.mrb[1].mxu1  ;;  %v439_v26 = vmul.f32 %v407_v18, %v407_v18 }
 0x137   : > { %417 = vst [vmem:[%s1058_s26 + $0x8] sm:$0xff] %v366_v20  ;;  %v424_v22 = vadd.f32 %v366_v20, %v364_v17  ;;  %v438_v23 = vmul.f32 %v366_v20, %v366_v20  ;;  %419 = vst [vmem:[%s1058_s26 + $0x18] sm:$0xff] %v409_v21  ;;  %v368_v24 = vpop.f32.mrb[2].mxu0  ;;  %v411_v25 = vpop.f32.mrb[2].mxu1  ;;  %v440_v38 = vmul.f32 %v409_v21, %v409_v21 }
 0x138   : > { %420 = vst [vmem:[%s1058_s26 + $0x20] sm:$0xff] %v368_v24  ;;  %v441_v27 = vmul.f32 %v368_v24, %v368_v24  ;;  %422 = vst [vmem:[%s1058_s26 + $0x30] sm:$0xff] %v411_v25  ;;  %v370_v28 = vpop.f32.mrb[3].mxu0  ;;  %v413_v29 = vpop.f32.mrb[3].mxu1  ;;  %v443_v34 = vmul.f32 %v411_v25, %v411_v25 }
 0x139   : > { %421 = vst [vmem:[%s1058_s26 + $0x28] sm:$0xff] %v370_v28  ;;  %v429_v30 = vadd.f32 %v370_v28, %v368_v24  ;;  %v442_v31 = vmul.f32 %v370_v28, %v370_v28  ;;  %423 = vst [vmem:[%s1058_s26 + $0x38] sm:$0xff] %v413_v29  ;;  %v425_v32 = vadd.f32 %v424_v22, %v407_v18 }
 0x13a   : > { %v445_v33 = vadd.f32 %v438_v23, %v437_v19  ;;  %v444_v40 = vmul.f32 %v413_v29, %v413_v29 }
 0x13b   : > { %v450_v35 = vadd.f32 %v442_v31, %v441_v27  ;;  %v426_v36 = vadd.f32 %v425_v32, %v409_v21  ;;  %v430_v37 = vadd.f32 %v429_v30, %v411_v25 }
 0x13c   : > { %v446_v39 = vadd.f32 %v445_v33, %v439_v26 }
 0x13d   : > { %427 = vadd.xlane.f32.xlu0 %v426_v36  ;;  %v431_v41 = vadd.f32 %v430_v37, %v413_v29  ;;  %v451_v42 = vadd.f32 %v450_v35, %v443_v34 }
 0x13e   : > { %v447_v43 = vadd.f32 %v446_v39, %v440_v38 }
 0x13f   : > { %v452_v44 = vadd.f32 %v451_v42, %v444_v40 }
 0x140   : > { %448 = vadd.xlane.f32.xlu1 %v447_v43 }
 0x141   : > { %432 = vadd.xlane.f32.xlu0 %v431_v41 }
 0x144   : > { %453 = vadd.xlane.f32.xlu1 %v452_v44 }
 0x145   : > { %808 = shalt.err (!%p805_p11)
}
 0x146   : > { %s809_s20 = scalar_lea.hbm %s1075_s11, 1024  ;;  %s813_s8 = scalar_lea.hbm %s1128_s2, 4096 }
 0x147   : > { %p810_p13 = scmp.ne.s32.totalorder %s1075_s11, %s809_s20  ;;  %p814_p12 = scmp.lt.u32.totalorder %s1075_s11, %s1128_s2 }
 0x148   : > { %p815_p0 = scmp.lt.u32.totalorder %s813_s8, %s809_s20  ;;  %p817_p7 = scmp.lt.u32.totalorder %s809_s20, %s1075_s11 }
 0x149   : > { %p811_p2 = pnand %p810_p13, %p1148_p9 }
 0x14a   : > { %p816_p4 = por %p815_p0, %p814_p12 }
 0x14b   : > { %p812_p6 = pneg %p811_p2 }
 0x14c   : > { %p818_p10 = por %p817_p7, %p816_p4 }
 0x14e   : > { %p819_p1 = pnand %p818_p10, %p812_p6 }
 0x150   : > { %822 = shalt.err (!%p819_p1)
}
 0x151   : > { %s877_s14 = smov 512   ;;  %s878_s25 = smov 2048   ;;  %vm434_vm3 = vcmask 7168  }
 0x152   : > { %s879_s6 = smov 32   ;;  %p248_p3 = scmp.lt.s32.totalorder %s926_s19, 3 }
 0x153   : > { %663 = dma.vmem_to_hbm [thread:$0]  (%p1148_p9), %s1069_s29, 1024, %s1075_s11, %s458_s7, %s877_s14, %s878_s25, %s879_s6  }
 0x154   : > { %s1155_s19 = smov (!%p248_p3, %s926_s19), 3 }
 0x155   : > { %s654_s10 = sshll.u32 %s1155_s19, 4 }
 0x156   : > { %s252_s5 = scalar_lea.vmem %s1129_s3, %s654_s10  ;;  %s257_s30 = scalar_lea.vmem %s1130_s4, %s654_s10 }
 0x1ca   : > { %v428_v45 = vpop.xlane.xlu0 %427 }
 0x1cb   : > { %435 = vst.msk [vmem:[%s252_s5] sm:$0xff] %vm434_vm3, %v428_v45 }
 0x1cd   : > { %v449_v46 = vpop.xlane.xlu1 %448 }
 0x1ce   : > { %455 = vst.msk [vmem:[%s257_s30] sm:$0xff] %vm434_vm3, %v449_v46  ;;  %v433_v47 = vpop.xlane.xlu0 %432 }
 0x1cf   : > { %436 = vst.msk [vmem:[%s252_s5 + $0x8] sm:$0xff] %vm434_vm3, %v433_v47 }
 0x1d1   : > { %v454_v48 = vpop.xlane.xlu1 %453 }
 0x1d2   : > { %456 = vst.msk [vmem:[%s257_s30 + $0x8] sm:$0xff] %vm434_vm3, %v454_v48 }
 0x1d3 PF: > { %p680_p9 = scmp.ge.s32.totalorder %s865_s18, 2  ;;  %s502_s19 = sand.u32 1, %s853_s15  }
 0x1d4   : > { %p1149_p8 = scmp.ne.s32.totalorder %s1138_s28, 0  ;;  %s503_s27 = scalar_lea.sflag [#allocation4], %s502_s19 }
 0x1d6   : > { %p674_p5 = pnand %p680_p9, %p1149_p8 }
 0x1d8   : > { %848 = dma.done.wait (!%p674_p5), %s503_s27, 1024  }
 0x1d9   : > { %850 = vsyncadd (!%p674_p5), %s503_s27, 4294966272  ;;  %p19_p11 = scmp.ge.s32.totalorder %s930_s21, 6   ;;  %s1150_s15 = smov %s857_s16 }
 0x1da   : > { %s1151_s16 = smov %s861_s17  ;;  %s1152_s17 = smov %s942_s24 }
 0x1db   : > { %s1153_s18 = smov %s930_s21  ;;  %21 = sbr.rel (!%p19_p11) target bundleno = 6 (0x6), region = 102 }
 0x1e2   :  { %524 = vsyncpa [#allocation3], 1 }
 0x1e3   :  { %526 = vsyncpa [#allocation3 + $0x1], 1 }
 0x1e4   :  { %527 = vsyncpa [#allocation6], 1 }
 0x1e5   :  { %529 = vsyncpa [#allocation6 + $0x1], 1 }
 0x1e6   :  { %530 = vsyncpa [#allocation4], 1 }
 0x1e7   :  { %532 = vsyncpa [#allocation4 + $0x1], 1 }

</bundles_post_ra>
